<compile_context>
chip_gen: v7x
topology: tpu7x:2x2x1
jax: 0.10.0
libtpu: 0.0.40
codegen_flags: <defaults>
</compile_context>

<pallas_src>
import jax
import jax.numpy as jnp
from jax import lax
from jax.experimental import pallas as pl
from jax.experimental.pallas import tpu as pltpu

EPS = 1e-5                      # nn.BatchNorm2d default eps
TP_BYTES_TARGET = 1 << 20       # ~1 MiB f32 activation slab per grid step


# ----------------------------------------------------------------------------
# Kernels (layout: channels on sublanes, TP pixels on lanes)
# ----------------------------------------------------------------------------
def _stats1_kernel(x_ref, n1_ref, sum_ref, gram_ref):
    """Pass 1: a = relu(x + noise1); accumulate per-channel sum(a) and Gram = a a^T."""
    s = pl.program_id(1)
    a = jnp.maximum(x_ref[...] + n1_ref[...], 0.0)          # (C, TP) + (C, 1)

    @pl.when(s == 0)
    def _init():
        sum_ref[...] = jnp.zeros_like(sum_ref)
        gram_ref[...] = jnp.zeros_like(gram_ref)

    sum_ref[...] += jnp.sum(a, axis=1, keepdims=True)
    gram_ref[...] += lax.dot_general(
        a, a, dimension_numbers=(((1,), (1,)), ((), ())),
        preferred_element_type=jnp.float32)


def _stats2_kernel(x_ref, vec_ref, w1t_ref, sum_ref, gram_ref):
    """Pass 2: q = relu(relu(W1f^T @ relu(x+n1) + b1f) + n2); accumulate sum/Gram of q.
    W1f/b1f already fold BN_a (input stats) and BN_b (analytic output stats)."""
    s = pl.program_id(1)
    a = jnp.maximum(x_ref[...] + vec_ref[:, 0:1], 0.0)                  # +noise1, ReLU
    p = jnp.maximum(
        jnp.dot(w1t_ref[...], a, preferred_element_type=jnp.float32)
        + vec_ref[:, 2:3], 0.0)                                         # folded conv1, ReLU
    q = jnp.maximum(p + vec_ref[:, 1:2], 0.0)                           # +noise2, ReLU

    @pl.when(s == 0)
    def _init():
        sum_ref[...] = jnp.zeros_like(sum_ref)
        gram_ref[...] = jnp.zeros_like(gram_ref)

    sum_ref[...] += jnp.sum(q, axis=1, keepdims=True)
    gram_ref[...] += lax.dot_general(
        q, q, dimension_numbers=(((1,), (1,)), ((), ())),
        preferred_element_type=jnp.float32)


def _apply_kernel(x_ref, vec_ref, mats_ref, o_ref):
    """Pass 3: fully fused forward -- all four BNs folded into the two 1x1 convs."""
    x = x_ref[...]
    a = jnp.maximum(x + vec_ref[:, 0:1], 0.0)                           # +noise1, ReLU
    p = jnp.maximum(
        jnp.dot(mats_ref[0], a, preferred_element_type=jnp.float32)
        + vec_ref[:, 2:3], 0.0)                                         # conv1 (BN_a,BN_b folded), ReLU
    q = jnp.maximum(p + vec_ref[:, 1:2], 0.0)                           # +noise2, ReLU
    r = jnp.dot(mats_ref[1], q, preferred_element_type=jnp.float32) + vec_ref[:, 3:4]
    o_ref[...] = jnp.maximum(r + x, 0.0)                                # residual + ReLU


# ----------------------------------------------------------------------------
# Wrapper helpers (tiny (C,)/(C,C)-sized plain-JAX glue)
# ----------------------------------------------------------------------------
def _choose_tp(HW, C, N):
    """Largest multiple-of-128 divisor of HW giving a ~1 MiB f32 slab; when N is odd,
    prefer a choice with an even total tile count so both v7x TensorCores engage."""
    if HW % 128 != 0:
        return HW                                        # full-extent lane block
    target = max(128, (TP_BYTES_TARGET // (4 * C)) // 128 * 128)
    cands = [d for d in range(128, min(HW, target) + 1, 128) if HW % d == 0]
    if not cands:
        return HW
    if N % 2 == 1:
        even = [d for d in cands if (HW // d) % 2 == 0]
        if even:
            return max(even)
    return max(cands)


def _fold_bn_pair(sum_v, gram, count, gamma_in, beta_in, w, b, gamma_out, beta_out):
    """Given sum and Gram of the conv input u (batch stats over `count` pixels), fold
    BN_in (pre-conv) and BN_out (post-conv; stats derived analytically) into one affine
        BN_out(conv(BN_in(u))) == w_full^T @ u + b_full      (per pixel column).
    Returns (C_in, C_out) w_full and (C_out,) b_full."""
    hp = lax.Precision.HIGHEST
    r = jnp.float32(count)
    mu = sum_v / r
    var = jnp.diagonal(gram) / r - mu * mu               # biased batch variance
    s_in = gamma_in * lax.rsqrt(var + EPS)
    w_eff = s_in[:, None] * w
    b_eff = b + jnp.dot(beta_in - mu * s_in, w, precision=hp)
    mean_out = jnp.dot(mu, w_eff, precision=hp) + b_eff
    # Var of (w_eff^T u): diag(w_eff^T E[u u^T] w_eff) - (w_eff^T E[u])^2
    var_out = (jnp.sum(jnp.dot(gram, w_eff, precision=hp) * w_eff, axis=0) / r
               - jnp.dot(mu, w_eff, precision=hp) ** 2)
    s_out = gamma_out * lax.rsqrt(var_out + EPS)
    w_full = w_eff * s_out[None, :]
    b_full = (b_eff - mean_out) * s_out + beta_out
    return w_full, b_full


def _pack_cols(*cols):
    """Pack per-channel vectors as lane columns of a single (C, 128) f32 tile."""
    m = jnp.stack([c.astype(jnp.float32) for c in cols], axis=1)
    return jnp.pad(m, ((0, 0), (0, 128 - m.shape[1])))


def _stats_call(kernel, args, in_specs, *, C, P, S, cost):
    sums, grams = pl.pallas_call(
        kernel,
        grid=(P, S),
        in_specs=in_specs,
        out_specs=(pl.BlockSpec((None, C, 1), lambda p, s: (p, 0, 0)),
                   pl.BlockSpec((None, C, C), lambda p, s: (p, 0, 0))),
        out_shape=(jax.ShapeDtypeStruct((P, C, 1), jnp.float32),
                   jax.ShapeDtypeStruct((P, C, C), jnp.float32)),
        compiler_params=pltpu.CompilerParams(
            dimension_semantics=("parallel", "arbitrary")),
        cost_estimate=cost,
    )(*args)
    return sums.sum(axis=0).reshape(-1), grams.sum(axis=0)


# ----------------------------------------------------------------------------
# Public forward
# ----------------------------------------------------------------------------
@jax.jit
def noise_no_pool_block(x_nchw, params):
    N, C, H, W = x_nchw.shape
    HW = H * W
    R = N * HW

    gamma_a = params["gamma_a"].reshape(-1); beta_a = params["beta_a"].reshape(-1)
    gamma_b = params["gamma_b"].reshape(-1); beta_b = params["beta_b"].reshape(-1)
    gamma_c = params["gamma_c"].reshape(-1); beta_c = params["beta_c"].reshape(-1)
    gamma_d = params["gamma_d"].reshape(-1); beta_d = params["beta_d"].reshape(-1)
    w1 = params["w1"].astype(jnp.float32); b1 = params["b1"].reshape(-1).astype(jnp.float32)
    w2 = params["w2"].astype(jnp.float32); b2 = params["b2"].reshape(-1).astype(jnp.float32)

    def eff_noise(noise_1c11):
        # NoiseLayer batch-mismatch branch: for batch != 1 the (1,C,1,1) noise is
        # replaced by a constant tensor filled with noise[0, 0, 0, 0].
        if N != 1:
            return jnp.full((C,), noise_1c11.reshape(-1)[0], dtype=jnp.float32)
        return noise_1c11.reshape(-1).astype(jnp.float32)

    n1 = eff_noise(params["noise1"])
    n2 = eff_noise(params["noise2"])

    # ---- static tiling plan: channels on sublanes, TP pixels on lanes ----
    TP = _choose_tp(HW, C, N)
    nt = HW // TP                      # pixel tiles per sample (TP always divides HW)
    total = N * nt
    P = 2 if (total >= 2 and total % 2 == 0) else 1   # v7x: both TCs on the stats passes
    S = total // P

    # (N,C,H,W) -> (N,C,H*W) is a contiguous dimension collapse: no transpose, no copy.
    x3 = x_nchw.reshape(N, C, HW).astype(jnp.float32)

    if nt == 1:
        xmap_ps = lambda p, s: (p * S + s, 0, 0)
        xmap_i = lambda i: (i, 0, 0)
    else:
        xmap_ps = lambda p, s: ((p * S + s) // nt, 0, (p * S + s) % nt)
        xmap_i = lambda i: (i // nt, 0, i % nt)
    x_spec_ps = pl.BlockSpec((None, C, TP), xmap_ps)
    x_spec_i = pl.BlockSpec((None, C, TP), xmap_i)
    o_spec_i = pl.BlockSpec((None, C, TP), xmap_i)

    bytes_x = R * C * 4
    ce1 = pl.CostEstimate(flops=2 * R * C * (C + 1), transcendentals=0,
                          bytes_accessed=bytes_x)
    ce2 = pl.CostEstimate(flops=4 * R * C * (C + 1), transcendentals=0,
                          bytes_accessed=bytes_x)
    ce3 = pl.CostEstimate(flops=4 * R * C * (C + 2), transcendentals=0,
                          bytes_accessed=2 * bytes_x)

    # ---- pass 1: stats of a = relu(x + n1) ----
    sum_a, gram_a = _stats_call(
        _stats1_kernel, (x3, n1.reshape(C, 1)),
        [x_spec_ps, pl.BlockSpec((C, 1), lambda p, s: (0, 0))],
        C=C, P=P, S=S, cost=ce1)

    # Fold BN_a (measured input stats) and BN_b (analytic conv-output stats) into conv1.
    w1_full, b1_full = _fold_bn_pair(sum_a, gram_a, R, gamma_a, beta_a, w1, b1,
                                     gamma_b, beta_b)
    w1t = w1_full.T                                       # (C_out, C_in) for W^T @ tile
    vec2 = _pack_cols(n1, n2, b1_full)                    # (C, 128): cols n1, n2, b1

    # ---- pass 2: stats of q = relu(relu(conv1'(a)) + n2) ----
    sum_q, gram_q = _stats_call(
        _stats2_kernel, (x3, vec2, w1t),
        [x_spec_ps,
         pl.BlockSpec((C, 128), lambda p, s: (0, 0)),
         pl.BlockSpec((C, C), lambda p, s: (0, 0))],
        C=C, P=P, S=S, cost=ce2)

    # Fold BN_c and BN_d into conv2.
    w2_full, b2_full = _fold_bn_pair(sum_q, gram_q, R, gamma_c, beta_c, w2, b2,
                                     gamma_d, beta_d)
    vec3 = _pack_cols(n1, n2, b1_full, b2_full)           # (C, 128)
    mats = jnp.stack([w1t, w2_full.T], axis=0)            # (2, C, C)

    # ---- pass 3: fused apply, fully parallel over (sample, pixel-tile) ----
    out3 = pl.pallas_call(
        _apply_kernel,
        grid=(total,),
        in_specs=[x_spec_i,
                  pl.BlockSpec((C, 128), lambda i: (0, 0)),
                  pl.BlockSpec((2, C, C), lambda i: (0, 0, 0))],
        out_specs=o_spec_i,
        out_shape=jax.ShapeDtypeStruct((N, C, HW), jnp.float32),
        compiler_params=pltpu.CompilerParams(dimension_semantics=("parallel",)),
        cost_estimate=ce3,
    )(x3, vec3, mats)

    return out3.reshape(N, C, H, W)                       # free dimension split


# ----------------------------------------------------------------------------
# Pure-JAX reference + params (for the correctness check)
# ----------------------------------------------------------------------------
def _bn_train(y, gamma, beta):
    mean = jnp.mean(y, axis=0, keepdims=True)
    var = jnp.mean((y - mean) ** 2, axis=0, keepdims=True)
    return (y - mean) * (gamma * lax.rsqrt(var + EPS)) + beta


def _reference(x_nchw, params):
    N, C, H, W = x_nchw.shape
    x = jnp.transpose(x_nchw, (0, 2, 3, 1)).reshape(-1, C)

    def eff(nz):
        return (jnp.full((1, C), nz.reshape(-1)[0]) if N != 1 else nz.reshape(1, C))

    y = jnp.maximum(x + eff(params["noise1"]), 0.0)
    y = _bn_train(y, params["gamma_a"], params["beta_a"])
    y = y @ params["w1"] + params["b1"]
    y = jnp.maximum(_bn_train(y, params["gamma_b"], params["beta_b"]), 0.0)
    y = jnp.maximum(y + eff(params["noise2"]), 0.0)
    y = _bn_train(y, params["gamma_c"], params["beta_c"])
    y = y @ params["w2"] + params["b2"]
    y = _bn_train(y, params["gamma_d"], params["beta_d"])
    y = jnp.maximum(y + x, 0.0)
    return y.reshape(N, H, W, C).transpose(0, 3, 1, 2)


def make_params(key, in_planes, planes):
    assert in_planes == planes, "identity residual (shortcut=None) needs in_planes == planes"
    C = in_planes
    ks = jax.random.split(key, 14)
    scale = 1.0 / jnp.sqrt(jnp.float32(C))

    def affine(kg, kb):
        return (1.0 + 0.1 * jax.random.normal(kg, (1, C), jnp.float32),
                0.1 * jax.random.normal(kb, (1, C), jnp.float32))

    g_a, b_a = affine(ks[6], ks[7]); g_b, b_b = affine(ks[8], ks[9])
    g_c, b_c = affine(ks[10], ks[11]); g_d, b_d = affine(ks[12], ks[13])
    return {
        "noise1": jax.random.normal(ks[0], (1, C, 1, 1), jnp.float32),
        "noise2": jax.random.normal(ks[1], (1, C, 1, 1), jnp.float32),
        # PyTorch Conv2d weight (out,in,1,1) maps to w = weight[:, :, 0, 0].T here.
        "w1": jax.random.normal(ks[2], (C, C), jnp.float32) * scale,
        "b1": jax.random.normal(ks[3], (1, C), jnp.float32) * 0.1,
        "w2": jax.random.normal(ks[4], (C, C), jnp.float32) * scale,
        "b2": jax.random.normal(ks[5], (1, C), jnp.float32) * 0.1,
        "gamma_a": g_a, "beta_a": b_a, "gamma_b": g_b, "beta_b": b_b,
        "gamma_c": g_c, "beta_c": b_c, "gamma_d": g_d, "beta_d": b_d,
    }


if __name__ == "__main__":
    key = jax.random.PRNGKey(0)
    # Cases exercise: N>1 constant-noise branch vs N==1 per-channel branch, single- and
    # multi-tile pixel accumulation (S=1 and S=2), the P=2 core split, non-pow2 spatial.
    cases = [(2, 32, 16, 16), (2, 32, 96, 96), (1, 16, 32, 32)]
    for (N, C, H, W) in cases:
        key, kx, kp = jax.random.split(key, 3)
        x = jax.random.normal(kx, (N, C, H, W), jnp.float32)
        params = make_params(kp, C, C)

        out = jax.block_until_ready(noise_no_pool_block(x, params))
        ref = _reference(x, params)
        assert out.shape == (N, C, H, W)
        err = float(jnp.max(jnp.abs(out - ref)))
        # One-pass (Gram-based) batch statistics differ from the reference's centered
        # two-pass form only by f32 rounding at these magnitudes.
        assert jnp.allclose(out, ref, atol=5e-4, rtol=5e-4), ((N, C, H, W), err)
    print("KERNEL_OK")
</pallas_src>

<mosaic_0001>
module attributes {stable_mosaic.version = 11 : i64} {
  func.func @_stats1_kernel(%arg0: i32, %arg1: i32, %arg2: memref<1x32x256xf32, #tpu.memory_space<vmem>>, %arg3: memref<32x1xf32, #tpu.memory_space<vmem>>, %arg4: memref<1x32x1xf32, #tpu.memory_space<vmem>>, %arg5: memref<1x32x32xf32, #tpu.memory_space<vmem>>) attributes {dimension_semantics = [#tpu.dimension_semantics<parallel>, #tpu.dimension_semantics<arbitrary>], iteration_bounds = array<i64: 2, 1>, scalar_prefetch = 0 : i64, scratch_operands = 0 : i64, tpu.core_type = #tpu.core_type<tc>, window_params = [{transform_indices = @transform_0, window_bounds = array<i64: 1, 32, 256>}, {pipeline_mode = #tpu.pipeline_mode<synchronous>, transform_indices = @transform_1, window_bounds = array<i64: 32, 1>}, {transform_indices = @transform_2, window_bounds = array<i64: 1, 32, 1>}, {transform_indices = @transform_3, window_bounds = array<i64: 1, 32, 32>}]} {
    %c0 = arith.constant 0 : index
    %c0_0 = arith.constant 0 : index
    %c0_1 = arith.constant 0 : index
    %0 = vector.load %arg2[%c0, %c0_0, %c0_1] : memref<1x32x256xf32, #tpu.memory_space<vmem>>, vector<1x32x256xf32>
    %1 = vector.shape_cast %0 : vector<1x32x256xf32> to vector<32x256xf32>
    %c0_2 = arith.constant 0 : index
    %c0_3 = arith.constant 0 : index
    %2 = vector.load %arg3[%c0_2, %c0_3] : memref<32x1xf32, #tpu.memory_space<vmem>>, vector<32x1xf32>
    %3 = vector.broadcast %2 : vector<32x1xf32> to vector<32x256xf32>
    %4 = arith.addf %1, %3 : vector<32x256xf32>
    %cst = arith.constant 0.000000e+00 : f32
    %5 = vector.broadcast %cst : f32 to vector<32x256xf32>
    %6 = arith.maximumf %4, %5 : vector<32x256xf32>
    %c0_i32 = arith.constant 0 : i32
    %7 = arith.cmpi eq, %arg1, %c0_i32 : i32
    %8 = arith.extui %7 : i1 to i32
    %c0_i32_4 = arith.constant 0 : i32
    %9 = arith.cmpi ne, %8, %c0_i32_4 : i32
    scf.if %9 {
      %cst_19 = arith.constant 0.000000e+00 : f32
      %25 = vector.broadcast %cst_19 : f32 to vector<32x1xf32>
      %c0_20 = arith.constant 0 : index
      %c0_21 = arith.constant 0 : index
      %c0_22 = arith.constant 0 : index
      %26 = vector.load %arg4[%c0_20, %c0_21, %c0_22] : memref<1x32x1xf32, #tpu.memory_space<vmem>>, vector<1x32x1xf32>
      %27 = vector.shape_cast %26 : vector<1x32x1xf32> to vector<32x1xf32>
      %28 = vector.shape_cast %25 : vector<32x1xf32> to vector<1x32x1xf32>
      tpu.vector_store %arg4[%c0_20, %c0_21, %c0_22], %28 {strides = array<i32>} : memref<1x32x1xf32, #tpu.memory_space<vmem>>, vector<1x32x1xf32>,
      %cst_23 = arith.constant 0.000000e+00 : f32
      %29 = vector.broadcast %cst_23 : f32 to vector<32x32xf32>
      %c0_24 = arith.constant 0 : index
      %c0_25 = arith.constant 0 : index
      %c0_26 = arith.constant 0 : index
      %30 = vector.load %arg5[%c0_24, %c0_25, %c0_26] : memref<1x32x32xf32, #tpu.memory_space<vmem>>, vector<1x32x32xf32>
      %31 = vector.shape_cast %30 : vector<1x32x32xf32> to vector<32x32xf32>
      %32 = vector.shape_cast %29 : vector<32x32xf32> to vector<1x32x32xf32>
      tpu.vector_store %arg5[%c0_24, %c0_25, %c0_26], %32 {strides = array<i32>} : memref<1x32x32xf32, #tpu.memory_space<vmem>>, vector<1x32x32xf32>,
    } else {
    }
    %c0_5 = arith.constant 0 : index
    %c0_6 = arith.constant 0 : index
    %c0_7 = arith.constant 0 : index
    %10 = vector.load %arg4[%c0_5, %c0_6, %c0_7] : memref<1x32x1xf32, #tpu.memory_space<vmem>>, vector<1x32x1xf32>
    %11 = vector.shape_cast %10 : vector<1x32x1xf32> to vector<32x1xf32>
    %cst_8 = arith.constant dense<0.000000e+00> : vector<32xf32>
    %12 = vector.multi_reduction <add>, %6, %cst_8 [1] : vector<32x256xf32> to vector<32xf32>
    %13 = vector.shape_cast %12 : vector<32xf32> to vector<32x1xf32>
    %14 = arith.addf %11, %13 : vector<32x1xf32>
    %c0_9 = arith.constant 0 : index
    %c0_10 = arith.constant 0 : index
    %c0_11 = arith.constant 0 : index
    %15 = vector.load %arg4[%c0_9, %c0_10, %c0_11] : memref<1x32x1xf32, #tpu.memory_space<vmem>>, vector<1x32x1xf32>
    %16 = vector.shape_cast %15 : vector<1x32x1xf32> to vector<32x1xf32>
    %17 = vector.shape_cast %14 : vector<32x1xf32> to vector<1x32x1xf32>
    tpu.vector_store %arg4[%c0_9, %c0_10, %c0_11], %17 {strides = array<i32>} : memref<1x32x1xf32, #tpu.memory_space<vmem>>, vector<1x32x1xf32>,
    %c0_12 = arith.constant 0 : index
    %c0_13 = arith.constant 0 : index
    %c0_14 = arith.constant 0 : index
    %18 = vector.load %arg5[%c0_12, %c0_13, %c0_14] : memref<1x32x32xf32, #tpu.memory_space<vmem>>, vector<1x32x32xf32>
    %19 = vector.shape_cast %18 : vector<1x32x32xf32> to vector<32x32xf32>
    %cst_15 = arith.constant dense<0.000000e+00> : vector<32x32xf32>
    %20 = tpu.matmul %6, %6, %cst_15 {dimension_numbers = #tpu.dot_dimension_numbers<[1], [1], [0], [0], [0, 0, 1, 0], [], []>} : vector<32x256xf32>, vector<32x256xf32>, vector<32x32xf32> -> vector<32x32xf32>
    %21 = arith.addf %19, %20 : vector<32x32xf32>
    %c0_16 = arith.constant 0 : index
    %c0_17 = arith.constant 0 : index
    %c0_18 = arith.constant 0 : index
    %22 = vector.load %arg5[%c0_16, %c0_17, %c0_18] : memref<1x32x32xf32, #tpu.memory_space<vmem>>, vector<1x32x32xf32>
    %23 = vector.shape_cast %22 : vector<1x32x32xf32> to vector<32x32xf32>
    %24 = vector.shape_cast %21 : vector<32x32xf32> to vector<1x32x32xf32>
    tpu.vector_store %arg5[%c0_16, %c0_17, %c0_18], %24 {strides = array<i32>} : memref<1x32x32xf32, #tpu.memory_space<vmem>>, vector<1x32x32xf32>,
    return
  }
  func.func @transform_0(%arg0: i32, %arg1: i32) -> (i32, i32, i32) {
    %c1_i32 = arith.constant 1 : i32
    %0 = arith.muli %arg0, %c1_i32 : i32
    %1 = arith.addi %0, %arg1 : i32
    %c0_i32 = arith.constant 0 : i32
    %c0_i32_0 = arith.constant 0 : i32
    %c0_i32_1 = arith.constant 0 : i32
    return %1, %c0_i32, %c0_i32_0 : i32, i32, i32
  }
  func.func @transform_1(%arg0: i32, %arg1: i32) -> (i32, i32) {
    %c0_i32 = arith.constant 0 : i32
    %c0_i32_0 = arith.constant 0 : i32
    %c0_i32_1 = arith.constant 0 : i32
    return %c0_i32, %c0_i32_0 : i32, i32
  }
  func.func @transform_2(%arg0: i32, %arg1: i32) -> (i32, i32, i32) {
    %c0_i32 = arith.constant 0 : i32
    %c0_i32_0 = arith.constant 0 : i32
    %c0_i32_1 = arith.constant 0 : i32
    return %arg0, %c0_i32, %c0_i32_0 : i32, i32, i32
  }
  func.func @transform_3(%arg0: i32, %arg1: i32) -> (i32, i32, i32) {
    %c0_i32 = arith.constant 0 : i32
    %c0_i32_0 = arith.constant 0 : i32
    %c0_i32_1 = arith.constant 0 : i32
    return %arg0, %c0_i32, %c0_i32_0 : i32, i32, i32
  }
}

module attributes {stable_mosaic.version = 11 : i64} {
  func.func @_stats2_kernel(%arg0: i32, %arg1: i32, %arg2: memref<1x32x256xf32, #tpu.memory_space<vmem>>, %arg3: memref<32x128xf32, #tpu.memory_space<vmem>>, %arg4: memref<32x32xf32, #tpu.memory_space<vmem>>, %arg5: memref<1x32x1xf32, #tpu.memory_space<vmem>>, %arg6: memref<1x32x32xf32, #tpu.memory_space<vmem>>) attributes {dimension_semantics = [#tpu.dimension_semantics<parallel>, #tpu.dimension_semantics<arbitrary>], iteration_bounds = array<i64: 2, 1>, scalar_prefetch = 0 : i64, scratch_operands = 0 : i64, tpu.core_type = #tpu.core_type<tc>, window_params = [{transform_indices = @transform_0, window_bounds = array<i64: 1, 32, 256>}, {pipeline_mode = #tpu.pipeline_mode<synchronous>, transform_indices = @transform_1, window_bounds = array<i64: 32, 128>}, {pipeline_mode = #tpu.pipeline_mode<synchronous>, transform_indices = @transform_2, window_bounds = array<i64: 32, 32>}, {transform_indices = @transform_3, window_bounds = array<i64: 1, 32, 1>}, {transform_indices = @transform_4, window_bounds = array<i64: 1, 32, 32>}]} {
    %c0 = arith.constant 0 : index
    %c0_0 = arith.constant 0 : index
    %c0_1 = arith.constant 0 : index
    %0 = vector.load %arg2[%c0, %c0_0, %c0_1] : memref<1x32x256xf32, #tpu.memory_space<vmem>>, vector<1x32x256xf32>
    %1 = vector.shape_cast %0 : vector<1x32x256xf32> to vector<32x256xf32>
    %c0_2 = arith.constant 0 : index
    %c0_3 = arith.constant 0 : index
    %2 = vector.load %arg3[%c0_2, %c0_3] : memref<32x128xf32, #tpu.memory_space<vmem>>, vector<32x1xf32>
    %3 = vector.broadcast %2 : vector<32x1xf32> to vector<32x256xf32>
    %4 = arith.addf %1, %3 : vector<32x256xf32>
    %cst = arith.constant 0.000000e+00 : f32
    %5 = vector.broadcast %cst : f32 to vector<32x256xf32>
    %6 = arith.maximumf %4, %5 : vector<32x256xf32>
    %c0_4 = arith.constant 0 : index
    %c0_5 = arith.constant 0 : index
    %7 = vector.load %arg4[%c0_4, %c0_5] : memref<32x32xf32, #tpu.memory_space<vmem>>, vector<32x32xf32>
    %cst_6 = arith.constant dense<0.000000e+00> : vector<32x256xf32>
    %8 = tpu.matmul %7, %6, %cst_6 {dimension_numbers = #tpu.dot_dimension_numbers<[1], [0], [0], [1], [0, 0, 1, 1], [], []>} : vector<32x32xf32>, vector<32x256xf32>, vector<32x256xf32> -> vector<32x256xf32>
    %c0_7 = arith.constant 0 : index
    %c2 = arith.constant 2 : index
    %9 = vector.load %arg3[%c0_7, %c2] : memref<32x128xf32, #tpu.memory_space<vmem>>, vector<32x1xf32>
    %10 = vector.broadcast %9 : vector<32x1xf32> to vector<32x256xf32>
    %11 = arith.addf %8, %10 : vector<32x256xf32>
    %cst_8 = arith.constant 0.000000e+00 : f32
    %12 = vector.broadcast %cst_8 : f32 to vector<32x256xf32>
    %13 = arith.maximumf %11, %12 : vector<32x256xf32>
    %c0_9 = arith.constant 0 : index
    %c1 = arith.constant 1 : index
    %14 = vector.load %arg3[%c0_9, %c1] : memref<32x128xf32, #tpu.memory_space<vmem>>, vector<32x1xf32>
    %15 = vector.broadcast %14 : vector<32x1xf32> to vector<32x256xf32>
    %16 = arith.addf %13, %15 : vector<32x256xf32>
    %cst_10 = arith.constant 0.000000e+00 : f32
    %17 = vector.broadcast %cst_10 : f32 to vector<32x256xf32>
    %18 = arith.maximumf %16, %17 : vector<32x256xf32>
    %c0_i32 = arith.constant 0 : i32
    %19 = arith.cmpi eq, %arg1, %c0_i32 : i32
    %20 = arith.extui %19 : i1 to i32
    %c0_i32_11 = arith.constant 0 : i32
    %21 = arith.cmpi ne, %20, %c0_i32_11 : i32
    scf.if %21 {
      %cst_26 = arith.constant 0.000000e+00 : f32
      %37 = vector.broadcast %cst_26 : f32 to vector<32x1xf32>
      %c0_27 = arith.constant 0 : index
      %c0_28 = arith.constant 0 : index
      %c0_29 = arith.constant 0 : index
      %38 = vector.load %arg5[%c0_27, %c0_28, %c0_29] : memref<1x32x1xf32, #tpu.memory_space<vmem>>, vector<1x32x1xf32>
      %39 = vector.shape_cast %38 : vector<1x32x1xf32> to vector<32x1xf32>
      %40 = vector.shape_cast %37 : vector<32x1xf32> to vector<1x32x1xf32>
      tpu.vector_store %arg5[%c0_27, %c0_28, %c0_29], %40 {strides = array<i32>} : memref<1x32x1xf32, #tpu.memory_space<vmem>>, vector<1x32x1xf32>,
      %cst_30 = arith.constant 0.000000e+00 : f32
      %41 = vector.broadcast %cst_30 : f32 to vector<32x32xf32>
      %c0_31 = arith.constant 0 : index
      %c0_32 = arith.constant 0 : index
      %c0_33 = arith.constant 0 : index
      %42 = vector.load %arg6[%c0_31, %c0_32, %c0_33] : memref<1x32x32xf32, #tpu.memory_space<vmem>>, vector<1x32x32xf32>
      %43 = vector.shape_cast %42 : vector<1x32x32xf32> to vector<32x32xf32>
      %44 = vector.shape_cast %41 : vector<32x32xf32> to vector<1x32x32xf32>
      tpu.vector_store %arg6[%c0_31, %c0_32, %c0_33], %44 {strides = array<i32>} : memref<1x32x32xf32, #tpu.memory_space<vmem>>, vector<1x32x32xf32>,
    } else {
    }
    %c0_12 = arith.constant 0 : index
    %c0_13 = arith.constant 0 : index
    %c0_14 = arith.constant 0 : index
    %22 = vector.load %arg5[%c0_12, %c0_13, %c0_14] : memref<1x32x1xf32, #tpu.memory_space<vmem>>, vector<1x32x1xf32>
    %23 = vector.shape_cast %22 : vector<1x32x1xf32> to vector<32x1xf32>
    %cst_15 = arith.constant dense<0.000000e+00> : vector<32xf32>
    %24 = vector.multi_reduction <add>, %18, %cst_15 [1] : vector<32x256xf32> to vector<32xf32>
    %25 = vector.shape_cast %24 : vector<32xf32> to vector<32x1xf32>
    %26 = arith.addf %23, %25 : vector<32x1xf32>
    %c0_16 = arith.constant 0 : index
    %c0_17 = arith.constant 0 : index
    %c0_18 = arith.constant 0 : index
    %27 = vector.load %arg5[%c0_16, %c0_17, %c0_18] : memref<1x32x1xf32, #tpu.memory_space<vmem>>, vector<1x32x1xf32>
    %28 = vector.shape_cast %27 : vector<1x32x1xf32> to vector<32x1xf32>
    %29 = vector.shape_cast %26 : vector<32x1xf32> to vector<1x32x1xf32>
    tpu.vector_store %arg5[%c0_16, %c0_17, %c0_18], %29 {strides = array<i32>} : memref<1x32x1xf32, #tpu.memory_space<vmem>>, vector<1x32x1xf32>,
    %c0_19 = arith.constant 0 : index
    %c0_20 = arith.constant 0 : index
    %c0_21 = arith.constant 0 : index
    %30 = vector.load %arg6[%c0_19, %c0_20, %c0_21] : memref<1x32x32xf32, #tpu.memory_space<vmem>>, vector<1x32x32xf32>
    %31 = vector.shape_cast %30 : vector<1x32x32xf32> to vector<32x32xf32>
    %cst_22 = arith.constant dense<0.000000e+00> : vector<32x32xf32>
    %32 = tpu.matmul %18, %18, %cst_22 {dimension_numbers = #tpu.dot_dimension_numbers<[1], [1], [0], [0], [0, 0, 1, 0], [], []>} : vector<32x256xf32>, vector<32x256xf32>, vector<32x32xf32> -> vector<32x32xf32>
    %33 = arith.addf %31, %32 : vector<32x32xf32>
    %c0_23 = arith.constant 0 : index
    %c0_24 = arith.constant 0 : index
    %c0_25 = arith.constant 0 : index
    %34 = vector.load %arg6[%c0_23, %c0_24, %c0_25] : memref<1x32x32xf32, #tpu.memory_space<vmem>>, vector<1x32x32xf32>
    %35 = vector.shape_cast %34 : vector<1x32x32xf32> to vector<32x32xf32>
    %36 = vector.shape_cast %33 : vector<32x32xf32> to vector<1x32x32xf32>
    tpu.vector_store %arg6[%c0_23, %c0_24, %c0_25], %36 {strides = array<i32>} : memref<1x32x32xf32, #tpu.memory_space<vmem>>, vector<1x32x32xf32>,
    return
  }
  func.func @transform_0(%arg0: i32, %arg1: i32) -> (i32, i32, i32) {
    %c1_i32 = arith.constant 1 : i32
    %0 = arith.muli %arg0, %c1_i32 : i32
    %1 = arith.addi %0, %arg1 : i32
    %c0_i32 = arith.constant 0 : i32
    %c0_i32_0 = arith.constant 0 : i32
    %c0_i32_1 = arith.constant 0 : i32
    return %1, %c0_i32, %c0_i32_0 : i32, i32, i32
  }
  func.func @transform_1(%arg0: i32, %arg1: i32) -> (i32, i32) {
    %c0_i32 = arith.constant 0 : i32
    %c0_i32_0 = arith.constant 0 : i32
    %c0_i32_1 = arith.constant 0 : i32
    return %c0_i32, %c0_i32_0 : i32, i32
  }
  func.func @transform_2(%arg0: i32, %arg1: i32) -> (i32, i32) {
    %c0_i32 = arith.constant 0 : i32
    %c0_i32_0 = arith.constant 0 : i32
    %c0_i32_1 = arith.constant 0 : i32
    return %c0_i32, %c0_i32_0 : i32, i32
  }
  func.func @transform_3(%arg0: i32, %arg1: i32) -> (i32, i32, i32) {
    %c0_i32 = arith.constant 0 : i32
    %c0_i32_0 = arith.constant 0 : i32
    %c0_i32_1 = arith.constant 0 : i32
    return %arg0, %c0_i32, %c0_i32_0 : i32, i32, i32
  }
  func.func @transform_4(%arg0: i32, %arg1: i32) -> (i32, i32, i32) {
    %c0_i32 = arith.constant 0 : i32
    %c0_i32_0 = arith.constant 0 : i32
    %c0_i32_1 = arith.constant 0 : i32
    return %arg0, %c0_i32, %c0_i32_0 : i32, i32, i32
  }
}

module attributes {stable_mosaic.version = 11 : i64} {
  func.func @_apply_kernel(%arg0: i32, %arg1: memref<1x32x256xf32, #tpu.memory_space<vmem>>, %arg2: memref<32x128xf32, #tpu.memory_space<vmem>>, %arg3: memref<2x32x32xf32, #tpu.memory_space<vmem>>, %arg4: memref<1x32x256xf32, #tpu.memory_space<vmem>>) attributes {dimension_semantics = [#tpu.dimension_semantics<parallel>], iteration_bounds = array<i64: 2>, scalar_prefetch = 0 : i64, scratch_operands = 0 : i64, tpu.core_type = #tpu.core_type<tc>, window_params = [{transform_indices = @transform_0, window_bounds = array<i64: 1, 32, 256>}, {pipeline_mode = #tpu.pipeline_mode<synchronous>, transform_indices = @transform_1, window_bounds = array<i64: 32, 128>}, {pipeline_mode = #tpu.pipeline_mode<synchronous>, transform_indices = @transform_2, window_bounds = array<i64: 2, 32, 32>}, {transform_indices = @transform_3, window_bounds = array<i64: 1, 32, 256>}]} {
    %c0 = arith.constant 0 : index
    %c0_0 = arith.constant 0 : index
    %c0_1 = arith.constant 0 : index
    %0 = vector.load %arg1[%c0, %c0_0, %c0_1] : memref<1x32x256xf32, #tpu.memory_space<vmem>>, vector<1x32x256xf32>
    %1 = vector.shape_cast %0 : vector<1x32x256xf32> to vector<32x256xf32>
    %c0_2 = arith.constant 0 : index
    %c0_3 = arith.constant 0 : index
    %2 = vector.load %arg2[%c0_2, %c0_3] : memref<32x128xf32, #tpu.memory_space<vmem>>, vector<32x1xf32>
    %3 = vector.broadcast %2 : vector<32x1xf32> to vector<32x256xf32>
    %4 = arith.addf %1, %3 : vector<32x256xf32>
    %cst = arith.constant 0.000000e+00 : f32
    %5 = vector.broadcast %cst : f32 to vector<32x256xf32>
    %6 = arith.maximumf %4, %5 : vector<32x256xf32>
    %c0_4 = arith.constant 0 : index
    %c0_5 = arith.constant 0 : index
    %c0_6 = arith.constant 0 : index
    %7 = vector.load %arg3[%c0_4, %c0_5, %c0_6] : memref<2x32x32xf32, #tpu.memory_space<vmem>>, vector<1x32x32xf32>
    %8 = vector.shape_cast %7 : vector<1x32x32xf32> to vector<32x32xf32>
    %cst_7 = arith.constant dense<0.000000e+00> : vector<32x256xf32>
    %9 = tpu.matmul %8, %6, %cst_7 {dimension_numbers = #tpu.dot_dimension_numbers<[1], [0], [0], [1], [0, 0, 1, 1], [], []>} : vector<32x32xf32>, vector<32x256xf32>, vector<32x256xf32> -> vector<32x256xf32>
    %c0_8 = arith.constant 0 : index
    %c2 = arith.constant 2 : index
    %10 = vector.load %arg2[%c0_8, %c2] : memref<32x128xf32, #tpu.memory_space<vmem>>, vector<32x1xf32>
    %11 = vector.broadcast %10 : vector<32x1xf32> to vector<32x256xf32>
    %12 = arith.addf %9, %11 : vector<32x256xf32>
    %cst_9 = arith.constant 0.000000e+00 : f32
    %13 = vector.broadcast %cst_9 : f32 to vector<32x256xf32>
    %14 = arith.maximumf %12, %13 : vector<32x256xf32>
    %c0_10 = arith.constant 0 : index
    %c1 = arith.constant 1 : index
    %15 = vector.load %arg2[%c0_10, %c1] : memref<32x128xf32, #tpu.memory_space<vmem>>, vector<32x1xf32>
    %16 = vector.broadcast %15 : vector<32x1xf32> to vector<32x256xf32>
    %17 = arith.addf %14, %16 : vector<32x256xf32>
    %cst_11 = arith.constant 0.000000e+00 : f32
    %18 = vector.broadcast %cst_11 : f32 to vector<32x256xf32>
    %19 = arith.maximumf %17, %18 : vector<32x256xf32>
    %c1_12 = arith.constant 1 : index
    %c0_13 = arith.constant 0 : index
    %c0_14 = arith.constant 0 : index
    %20 = vector.load %arg3[%c1_12, %c0_13, %c0_14] : memref<2x32x32xf32, #tpu.memory_space<vmem>>, vector<1x32x32xf32>
    %21 = vector.shape_cast %20 : vector<1x32x32xf32> to vector<32x32xf32>
    %cst_15 = arith.constant dense<0.000000e+00> : vector<32x256xf32>
    %22 = tpu.matmul %21, %19, %cst_15 {dimension_numbers = #tpu.dot_dimension_numbers<[1], [0], [0], [1], [0, 0, 1, 1], [], []>} : vector<32x32xf32>, vector<32x256xf32>, vector<32x256xf32> -> vector<32x256xf32>
    %c0_16 = arith.constant 0 : index
    %c3 = arith.constant 3 : index
    %23 = vector.load %arg2[%c0_16, %c3] : memref<32x128xf32, #tpu.memory_space<vmem>>, vector<32x1xf32>
    %24 = vector.broadcast %23 : vector<32x1xf32> to vector<32x256xf32>
    %25 = arith.addf %22, %24 : vector<32x256xf32>
    %26 = arith.addf %25, %1 : vector<32x256xf32>
    %cst_17 = arith.constant 0.000000e+00 : f32
    %27 = vector.broadcast %cst_17 : f32 to vector<32x256xf32>
    %28 = arith.maximumf %26, %27 : vector<32x256xf32>
    %c0_18 = arith.constant 0 : index
    %c0_19 = arith.constant 0 : index
    %c0_20 = arith.constant 0 : index
    %29 = vector.load %arg4[%c0_18, %c0_19, %c0_20] : memref<1x32x256xf32, #tpu.memory_space<vmem>>, vector<1x32x256xf32>
    %30 = vector.shape_cast %29 : vector<1x32x256xf32> to vector<32x256xf32>
    %31 = vector.shape_cast %28 : vector<32x256xf32> to vector<1x32x256xf32>
    tpu.vector_store %arg4[%c0_18, %c0_19, %c0_20], %31 {strides = array<i32>} : memref<1x32x256xf32, #tpu.memory_space<vmem>>, vector<1x32x256xf32>,
    return
  }
  func.func @transform_0(%arg0: i32) -> (i32, i32, i32) {
    %c0_i32 = arith.constant 0 : i32
    %c0_i32_0 = arith.constant 0 : i32
    %c0_i32_1 = arith.constant 0 : i32
    return %arg0, %c0_i32, %c0_i32_0 : i32, i32, i32
  }
  func.func @transform_1(%arg0: i32) -> (i32, i32) {
    %c0_i32 = arith.constant 0 : i32
    %c0_i32_0 = arith.constant 0 : i32
    %c0_i32_1 = arith.constant 0 : i32
    return %c0_i32, %c0_i32_0 : i32, i32
  }
  func.func @transform_2(%arg0: i32) -> (i32, i32, i32) {
    %c0_i32 = arith.constant 0 : i32
    %c0_i32_0 = arith.constant 0 : i32
    %c0_i32_1 = arith.constant 0 : i32
    %c0_i32_2 = arith.constant 0 : i32
    return %c0_i32, %c0_i32_0, %c0_i32_1 : i32, i32, i32
  }
  func.func @transform_3(%arg0: i32) -> (i32, i32, i32) {
    %c0_i32 = arith.constant 0 : i32
    %c0_i32_0 = arith.constant 0 : i32
    %c0_i32_1 = arith.constant 0 : i32
    return %arg0, %c0_i32, %c0_i32_0 : i32, i32, i32
  }
}

</mosaic_0001>

<bundles_post_ra>
// kernel: noise_no_pool_block.3
= control target key start
LH: loop header
LB: loop body
LE: loop exit
PB: predicated region body
PF: predicated region fallthrough
CT: control target
= control target key end

     0   :  { %s586_s12 = smov 0   ;;  %s588_s13 = smov 0   ;;  %s694_s0 = inlined_call_operand.vmem [shape: f32[2,32,256], index: 0, kind: input, shape index: {}]   ;;  %s695_s1 = inlined_call_operand.vmem [shape: f32[32,1], index: 1, kind: input, shape index: {}]   ;;  %s696_s2 = inlined_call_operand.vmem [shape: f32[2,32,1], index: 2, kind: output, shape index: {0}]   ;;  %s697_s3 = inlined_call_operand.vmem [shape: f32[2,32,32], index: 3, kind: output, shape index: {1}]  }
   0x1   :  { %s590_s14 = smov 0  }
   0x2 LB: > { %s26_s15 = sadd.s32 1, %s558_s13  ;;  %p488_p0 = scmp.ge.s32.totalorder %s562_s14, 1  ;;  %s562_s14 = sphi %s590_s14, %s14_s14   ;;  %s558_s13 = sphi %s588_s13, %s699_s13   ;;  %s554_s12 = sphi %s586_s12, %s698_s12  }
   0x3   : > { %p28_p1 = scmp.ge.s32.totalorder %s26_s15, 2  ;;  %p156_p2 = scmp.lt.s32.totalorder %s562_s14, 3 }
   0x5   : > { %s701_s15 = smov (%p28_p1, %s26_s15), 0  ;;  %p157_p3 = pnand %p488_p0, %p156_p2 }
   0x6   : > { %v211_v0 = vld [vmem:[%s695_s1] sm:$0xff] (!%p157_p3)  ;;  %v213_v1 = vld [vmem:[%s695_s1 + $0x10] sm:$0xff] (!%p157_p3)  ;;  %v564_v2 = vmov (!%p157_p3), 0   ;;  %v212_v3 = vld [vmem:[%s695_s1 + $0x8] sm:$0xff] (!%p157_p3)  ;;  %p187_p4 = scmp.lt.s32.totalorder (!%p157_p3), %s554_s12, 1  ;;  %vm255_vm0 = vcmask (!%p157_p3), 7168  }
   0x7   : > { %160 = sbr.rel (%p157_p3) target bundleno = 382 (0x17e), region = 28  ;;  %538 = vset.pattern.permute.xlu0 (!%p157_p3), %v564_v2  ;;  %539 = vset.pattern.permute.xlu1 (!%p157_p3), %v564_v2  ;;  %v214_v4 = vld [vmem:[%s695_s1 + $0x18] sm:$0xff] (!%p157_p3)  ;;  %v565_v5 = vmov (!%p157_p3), 0.0   ;;  %vm260_vm1 = vcmask (!%p157_p3), 261120  }
   0x8   : > { %217 = vperm.xlu0 (!%p157_p3), %538, %v211_v0   ;;  %227 = vperm.xlu1 (!%p157_p3), %539, %v213_v1  }
   0xc   : > { %222 = vperm.xlu0 (!%p157_p3), %538, %v212_v3   ;;  %232 = vperm.xlu1 (!%p157_p3), %539, %v214_v4  }
   0xe   : > { %s703_s12 = smov (!%p187_p4, %s554_s12), 1 }
   0xf   : > { %s498_s24 = sshll.u32 %s703_s12, 5  ;;  %s497_s28 = sshll.u32 %s703_s12, 6 }
  0x10   : > { %s624_s27 = scalar_lea.vmem %s696_s2, %s498_s24  ;;  %s191_s4 = scalar_lea.vmem %s694_s0, %s497_s28 }
  0x11   : > { %256 = vst.msk [vmem:[%s624_s27] sm:$0xff] %vm255_vm0, %v565_v5  ;;  %257 = vst.msk [vmem:[%s624_s27 + $0x8] sm:$0xff] %vm255_vm0, %v565_v5  ;;  %v203_v6 = vld [vmem:[%s191_s4] sm:$0xff]  ;;  %v204_v7 = vld [vmem:[%s191_s4 + $0x8] sm:$0xff]  ;;  %s647_s7 = scalar_lea.vmem %s697_s3, %s498_s24 }
  0x12   : > { %258 = vst.msk [vmem:[%s624_s27 + $0x10] sm:$0xff] %vm255_vm0, %v565_v5  ;;  %259 = vst.msk [vmem:[%s624_s27 + $0x18] sm:$0xff] %vm255_vm0, %v565_v5  ;;  %v207_v8 = vld [vmem:[%s191_s4 + $0x20] sm:$0xff]  ;;  %v208_v9 = vld [vmem:[%s191_s4 + $0x28] sm:$0xff] }
  0x13   : > { %v205_v16 = vld [vmem:[%s191_s4 + $0x10] sm:$0xff]  ;;  %v206_v17 = vld [vmem:[%s191_s4 + $0x18] sm:$0xff]  ;;  %261 = vst.msk [vmem:[%s647_s7] sm:$0xff] %vm260_vm1, %v565_v5  ;;  %262 = vst.msk [vmem:[%s647_s7 + $0x8] sm:$0xff] %vm260_vm1, %v565_v5 }
  0x14   : > { %v209_v18 = vld [vmem:[%s191_s4 + $0x30] sm:$0xff]  ;;  %v210_v21 = vld [vmem:[%s191_s4 + $0x38] sm:$0xff]  ;;  %263 = vst.msk [vmem:[%s647_s7 + $0x10] sm:$0xff] %vm260_vm1, %v565_v5  ;;  %264 = vst.msk [vmem:[%s647_s7 + $0x18] sm:$0xff] %vm260_vm1, %v565_v5 }
  0x18   : > { %v265_v42 = vld [vmem:[%s624_s27] sm:$0xff]  ;;  %v266_v45 = vld [vmem:[%s624_s27 + $0x8] sm:$0xff] }
  0x19   : > { %v267_v46 = vld [vmem:[%s624_s27 + $0x10] sm:$0xff]  ;;  %v268_v51 = vld [vmem:[%s624_s27 + $0x18] sm:$0xff] }
  0x1a   : > { %v290_v54 = vld [vmem:[%s647_s7] sm:$0xff]  ;;  %v291_v62 = vld [vmem:[%s647_s7 + $0x8] sm:$0xff] }
  0x1b   : > { %v292_v55 = vld [vmem:[%s647_s7 + $0x10] sm:$0xff]  ;;  %v293_v63 = vld [vmem:[%s647_s7 + $0x18] sm:$0xff] }
  0x87   : > { %v218_v10 = vpop.permute.xlu0 %217  ;;  %v228_v11 = vpop.permute.xlu1 %227 }
  0x88   : > { %v235_v12 = vadd.f32 %v218_v10, %v203_v6  ;;  %v236_v13 = vadd.f32 %v218_v10, %v204_v7  ;;  %v239_v14 = vadd.f32 %v228_v11, %v207_v8  ;;  %v240_v15 = vadd.f32 %v228_v11, %v208_v9 }
  0x8a   : > { %v243_v19 = vmax.f32 %v235_v12, 0.0  ;;  %v244_v20 = vmax.f32 %v236_v13, 0.0  ;;  %v247_v22 = vmax.f32 %v239_v14, 0.0  ;;  %v248_v23 = vmax.f32 %v240_v15, 0.0 }
  0x8b   : > { %v223_v24 = vpop.permute.xlu0 %222  ;;  %v233_v25 = vpop.permute.xlu1 %232 }
  0x8c   : > { %v237_v26 = vadd.f32 %v223_v24, %v205_v16  ;;  %v238_v27 = vadd.f32 %v223_v24, %v206_v17  ;;  %358 = vmatprep.mubr.f32.mxu0 %v244_v20  ;;  %v269_v28 = vadd.f32 %v244_v20, %v243_v19  ;;  %v241_v29 = vadd.f32 %v233_v25, %v209_v18 }
  0x8d   : > { %v242_v30 = vadd.f32 %v233_v25, %v210_v21  ;;  %368 = vmatprep.mubr.f32.mxu1 %v248_v23  ;;  %v275_v35 = vadd.f32 %v248_v23, %v247_v22 }
  0x8e   : > { %v245_v31 = vmax.f32 %v237_v26, 0.0  ;;  %v246_v32 = vmax.f32 %v238_v27, 0.0  ;;  %270 = vadd.xlane.f32.xlu0 %v269_v28  ;;  %v249_v33 = vmax.f32 %v241_v29, 0.0 }
  0x8f   : > { %v250_v34 = vmax.f32 %v242_v30, 0.0 }
  0x90   : > { %v272_v36 = vadd.f32 %v246_v32, %v245_v31  ;;  %v500_v37 = vpack.c.bf16 %v246_v32, %v244_v20  ;;  %v502_v38 = vpack.c.bf16 %v245_v31, %v243_v19  ;;  %v506_v41 = vpack.c.bf16 %v249_v33, %v247_v22 }
  0x91   : > { %v504_v39 = vpack.c.bf16 %v250_v34, %v248_v23  ;;  %v278_v40 = vadd.f32 %v250_v34, %v249_v33 }
  0x92   : > { %273 = vadd.xlane.f32.xlu1 %v272_v36  ;;  %501 = vmatprep.subr.bf16.mxu0 %v500_v37 }
  0x93   : > { %508 = vmatprep.subr.bf16.mxu1 %v500_v37  ;;  %276 = vadd.xlane.f32.xlu0 %v275_v35 }
  0x94   : > { %503 = vmatpush1.bf16.xpose.msra.mxu0 %v502_v38  ;;  %510 = vmatpush1.bf16.xpose.msra.mxu1 %v502_v38 }
  0x95   : > { %505 = vmatprep.subr.bf16.mxu0 %v504_v39  ;;  %509 = vmatprep.subr.bf16.mxu1 %v504_v39 }
  0x97   : > { %279 = vadd.xlane.f32.xlu0 %v278_v40 }
  0x9c   : > { %507 = vmatpush1.bf16.xpose.msra.mxu0 %v506_v41  ;;  %511 = vmatpush1.bf16.xpose.msra.mxu1 %v506_v41 }
  0xa3   : > { %359 = vmatmul.mubr.f32.vlgmr.msra.gmra.mrb[0].mxu0 %v243_v19  ;;  %369 = vmatmul.mubr.f32.vlgmr.msra.gmra.mrb[0].mxu1 %v247_v22 }
  0xa4   : > { %363 = vmatprep.mubr.f32.mxu0 %v246_v32  ;;  %373 = vmatprep.mubr.f32.mxu1 %v250_v34 }
  0xa7   : > { %364 = vmatmul.mubr.f32.gmra.mrb[2].mxu0 %v245_v31  ;;  %374 = vmatmul.mubr.f32.gmra.mrb[2].mxu1 %v249_v33 }
 0x11b   : > { %v271_v43 = vpop.xlane.xlu0 %270 }
 0x11c   : > { %v281_v44 = vadd.f32 %v271_v43, %v265_v42 }
 0x11e   : > { %286 = vst.msk [vmem:[%s624_s27] sm:$0xff] %vm255_vm0, %v281_v44 }
 0x11f   : > { %v274_v47 = vpop.xlane.xlu1 %273 }
 0x120   : > { %v282_v48 = vadd.f32 %v274_v47, %v266_v45  ;;  %v277_v49 = vpop.xlane.xlu0 %276 }
 0x121   : > { %v283_v50 = vadd.f32 %v277_v49, %v267_v46 }
 0x122   : > { %287 = vst.msk [vmem:[%s624_s27 + $0x8] sm:$0xff] %vm255_vm0, %v282_v48 }
 0x123   : > { %288 = vst.msk [vmem:[%s624_s27 + $0x10] sm:$0xff] %vm255_vm0, %v283_v50 }
 0x124   : > { %v280_v52 = vpop.xlane.xlu0 %279 }
 0x125   : > { %v284_v53 = vadd.f32 %v280_v52, %v268_v51 }
 0x127   : > { %289 = vst.msk [vmem:[%s624_s27 + $0x18] sm:$0xff] %vm255_vm0, %v284_v53 }
 0x176   : > { %v360_v56 = vpop.f32.mrb[0].mxu0  ;;  %v370_v57 = vpop.f32.mrb[0].mxu1 }
 0x177   : > { %v379_v58 = vadd.f32 %v360_v56, %v290_v54  ;;  %v381_v59 = vadd.f32 %v370_v57, %v292_v55  ;;  %v362_v60 = vpop.f32.mrb[1].mxu0  ;;  %v372_v61 = vpop.f32.mrb[1].mxu1 }
 0x179   : > { %384 = vst.msk [vmem:[%s647_s7] sm:$0xff] %vm260_vm1, %v379_v58  ;;  %386 = vst.msk [vmem:[%s647_s7 + $0x10] sm:$0xff] %vm260_vm1, %v381_v59 }
 0x17a   : > { %v365_v0 = vpop.f32.mrb[2].mxu0  ;;  %v375_v1 = vpop.f32.mrb[2].mxu1 }
 0x17b   : > { %v380_v2 = vadd.f32 %v365_v0, %v291_v62  ;;  %v382_v3 = vadd.f32 %v375_v1, %v293_v63  ;;  %v367_v4 = vpop.f32.mrb[3].mxu0  ;;  %v377_v5 = vpop.f32.mrb[3].mxu1 }
 0x17d   : > { %385 = vst.msk [vmem:[%s647_s7 + $0x8] sm:$0xff] %vm260_vm1, %v380_v2  ;;  %387 = vst.msk [vmem:[%s647_s7 + $0x18] sm:$0xff] %vm260_vm1, %v382_v3 }
 0x17e PF: > { %s14_s14 = sadd.s32 1, %s562_s14   ;;  %s698_s12 = smov %s558_s13 }
 0x17f   : > { %p11_p5 = scmp.ge.s32.totalorder %s14_s14, 4   ;;  %s699_s13 = smov %s701_s15 }
 0x181   :  { %13 = sbr.rel (!%p11_p5) target bundleno = 2 (0x2), region = 74 }

// kernel: noise_no_pool_block.4
= control target key start
LH: loop header
LB: loop body
LE: loop exit
PB: predicated region body
PF: predicated region fallthrough
CT: control target
= control target key end

     0   :  { %s800_s15 = smov 0   ;;  %s802_s16 = smov 0   ;;  %s928_s0 = inlined_call_operand.vmem [shape: f32[2,32,256], index: 0, kind: input, shape index: {}]   ;;  %s929_s1 = inlined_call_operand.vmem [shape: f32[32,128], index: 1, kind: input, shape index: {}]   ;;  %s930_s2 = inlined_call_operand.vmem [shape: f32[32,32], index: 2, kind: input, shape index: {}]   ;;  %s931_s3 = inlined_call_operand.vmem [shape: f32[2,32,1], index: 3, kind: output, shape index: {0}]   ;;  %s932_s4 = inlined_call_operand.vmem [shape: f32[2,32,32], index: 4, kind: output, shape index: {1}]  }
   0x1   :  { %s804_s17 = smov 0  }
   0x2 LB: > { %s27_s18 = sadd.s32 1, %s765_s16  ;;  %p675_p0 = scmp.ge.s32.totalorder %s769_s17, 1  ;;  %s769_s17 = sphi %s804_s17, %s15_s17   ;;  %s765_s16 = sphi %s802_s16, %s934_s16   ;;  %s761_s15 = sphi %s800_s15, %s933_s15  }
   0x3   : > { %p29_p1 = scmp.ge.s32.totalorder %s27_s18, 2  ;;  %p181_p2 = scmp.lt.s32.totalorder %s769_s17, 3 }
   0x5   : > { %s936_s18 = smov (%p29_p1, %s27_s18), 0  ;;  %p182_p3 = pnand %p675_p0, %p181_p2 }
   0x6   : > { %v240_v0 = vld [vmem:[%s929_s1 + $0x10] sm:$0xff] (!%p182_p3)  ;;  %v238_v1 = vld [vmem:[%s929_s1] sm:$0xff] (!%p182_p3)  ;;  %v771_v2 = vmov (!%p182_p3), 0   ;;  %v241_v3 = vld [vmem:[%s929_s1 + $0x18] sm:$0xff] (!%p182_p3)  ;;  %p214_p4 = scmp.lt.s32.totalorder (!%p182_p3), %s761_s15, 1  ;;  %vm298_vm0 = vcmask (!%p182_p3), 261120  }
   0x7   : > { %185 = sbr.rel (%p182_p3) target bundleno = 621 (0x26d), region = 32  ;;  %740 = vset.pattern.permute.xlu1 (!%p182_p3), %v771_v2  ;;  %739 = vset.pattern.permute.xlu0 (!%p182_p3), %v771_v2  ;;  %v239_v4 = vld [vmem:[%s929_s1 + $0x8] sm:$0xff] (!%p182_p3)  ;;  %v772_v5 = vmov (!%p182_p3), 0.0   ;;  %v773_v6 = vmov (!%p182_p3), 2   ;;  %v774_v7 = vmov (!%p182_p3), 1   ;;  %v278_v40 = vld [vmem:[%s930_s2] sm:$0xff] (!%p182_p3) }
   0x8   : > { %254 = vperm.xlu1 (!%p182_p3), %740, %v240_v0   ;;  %244 = vperm.xlu0 (!%p182_p3), %739, %v238_v1   ;;  %v279_v41 = vld [vmem:[%s930_s2 + $0x8] sm:$0xff] (!%p182_p3)  ;;  %v280_v42 = vld [vmem:[%s930_s2 + $0x10] sm:$0xff] (!%p182_p3)  ;;  %v281_v43 = vld [vmem:[%s930_s2 + $0x18] sm:$0xff] (!%p182_p3)  ;;  %vm444_vm1 = vcmask (!%p182_p3), 7168  }
   0x9   : > { %375 = vmatprep.mubr.f32.mxu0 (!%p182_p3), %v772_v5 }
   0xc   : > { %259 = vperm.xlu1 (!%p182_p3), %740, %v241_v3   ;;  %249 = vperm.xlu0 (!%p182_p3), %739, %v239_v4  }
   0xe   : > { %s938_s15 = smov (!%p214_p4, %s761_s15), 1 }
   0xf   : > { %s689_s27 = sshll.u32 %s938_s15, 5  ;;  %s688_s5 = sshll.u32 %s938_s15, 6 }
  0x10   : > { %s838_s30 = scalar_lea.vmem %s932_s4, %s689_s27  ;;  %742 = vset.pattern.permute.xlu1 %v773_v6  ;;  %741 = vset.pattern.permute.xlu0 %v773_v6  ;;  %s218_s8 = scalar_lea.vmem %s928_s0, %s688_s5 }
  0x11   : > { %449 = vst.msk [vmem:[%s838_s30] sm:$0xff] %vm298_vm0, %v772_v5  ;;  %450 = vst.msk [vmem:[%s838_s30 + $0x8] sm:$0xff] %vm298_vm0, %v772_v5  ;;  %287 = vperm.xlu1 %742, %v239_v4   ;;  %283 = vperm.xlu0 %741, %v238_v1   ;;  %v235_v8 = vld [vmem:[%s218_s8 + $0x28] sm:$0xff]  ;;  %v230_v9 = vld [vmem:[%s218_s8] sm:$0xff]  ;;  %s881_s23 = scalar_lea.vmem %s931_s3, %s689_s27 }
  0x12   : > { %451 = vst.msk [vmem:[%s838_s30 + $0x10] sm:$0xff] %vm298_vm0, %v772_v5  ;;  %452 = vst.msk [vmem:[%s838_s30 + $0x18] sm:$0xff] %vm298_vm0, %v772_v5  ;;  %v231_v12 = vld [vmem:[%s218_s8 + $0x8] sm:$0xff]  ;;  %v237_v15 = vld [vmem:[%s218_s8 + $0x38] sm:$0xff] }
  0x13   : > { %v232_v16 = vld [vmem:[%s218_s8 + $0x10] sm:$0xff]  ;;  %v233_v17 = vld [vmem:[%s218_s8 + $0x18] sm:$0xff]  ;;  %v234_v18 = vld [vmem:[%s218_s8 + $0x20] sm:$0xff]  ;;  %445 = vst.msk [vmem:[%s881_s23] sm:$0xff] %vm444_vm1, %v772_v5 }
  0x14   : > { %v236_v20 = vld [vmem:[%s218_s8 + $0x30] sm:$0xff]  ;;  %446 = vst.msk [vmem:[%s881_s23 + $0x8] sm:$0xff] %vm444_vm1, %v772_v5  ;;  %447 = vst.msk [vmem:[%s881_s23 + $0x10] sm:$0xff] %vm444_vm1, %v772_v5 }
  0x15   : > { %743 = vset.pattern.permute.xlu1 %v774_v7  ;;  %744 = vset.pattern.permute.xlu0 %v774_v7  ;;  %448 = vst.msk [vmem:[%s881_s23 + $0x18] sm:$0xff] %vm444_vm1, %v772_v5 }
  0x16   : > { %409 = vperm.xlu1 %743, %v238_v1   ;;  %413 = vperm.xlu0 %744, %v239_v4  }
  0x1a   : > { %745 = vset.pattern.permute.xlu1 %v773_v6  ;;  %417 = vperm.xlu0 %744, %v240_v0  }
  0x1b   : > { %291 = vperm.xlu1 %745, %v240_v0  }
  0x1f   : > { %295 = vperm.xlu1 %745, %v241_v3  }
  0x23   : > { %746 = vset.pattern.permute.xlu1 %v774_v7 }
  0x24   : > { %421 = vperm.xlu1 %746, %v241_v3  }
  0x87   : > { %v255_v10 = vpop.permute.xlu1 %254  ;;  %v245_v11 = vpop.permute.xlu0 %244 }
  0x88   : > { %v267_v13 = vadd.f32 %v255_v10, %v235_v8  ;;  %v262_v14 = vadd.f32 %v245_v11, %v230_v9  ;;  %v263_v19 = vadd.f32 %v245_v11, %v231_v12  ;;  %v266_v26 = vadd.f32 %v255_v10, %v234_v18 }
  0x8a   : > { %v275_v27 = vmax.f32 %v267_v13, 0.0  ;;  %v270_v28 = vmax.f32 %v262_v14, 0.0  ;;  %v271_v32 = vmax.f32 %v263_v19, 0.0  ;;  %v274_v36 = vmax.f32 %v266_v26, 0.0 }
  0x8b   : > { %v260_v21 = vpop.permute.xlu1 %259  ;;  %v250_v22 = vpop.permute.xlu0 %249 }
  0x8c   : > { %v269_v23 = vadd.f32 %v260_v21, %v237_v15  ;;  %v264_v24 = vadd.f32 %v250_v22, %v232_v16  ;;  %v265_v25 = vadd.f32 %v250_v22, %v233_v17  ;;  %v268_v29 = vadd.f32 %v260_v21, %v236_v20 }
  0x8e   : > { %v277_v30 = vmax.f32 %v269_v23, 0.0  ;;  %v272_v31 = vmax.f32 %v264_v24, 0.0  ;;  %v273_v33 = vmax.f32 %v265_v25, 0.0  ;;  %v276_v37 = vmax.f32 %v268_v29, 0.0 }
  0x90   : > { %v691_v34 = vpack.c.bf16 %v273_v33, %v271_v32  ;;  %v693_v35 = vpack.c.bf16 %v272_v31, %v270_v28  ;;  %v695_v38 = vpack.c.bf16 %v277_v30, %v275_v27  ;;  %v697_v39 = vpack.c.bf16 %v276_v37, %v274_v36  ;;  %v288_v44 = vpop.permute.xlu1 %287  ;;  %v284_v46 = vpop.permute.xlu0 %283  ;;  %v453_v36 = vld [vmem:[%s881_s23] sm:$0xff] }
  0x92   : > { %692 = vmatprep.subr.bf16.mxu0 %v691_v34 }
  0x93   : > { %694 = vmatpush1.bf16.msra.mxu0 %v693_v35 }
  0x94   : > { %696 = vmatprep.subr.bf16.mxu0 %v695_v38 }
  0x95   : > { %v410_v45 = vpop.permute.xlu1 %409  ;;  %v414_v59 = vpop.permute.xlu0 %413 }
  0x97   : > { %698 = vmatpush1.bf16.msra.mxu0 %v697_v39  ;;  %v454_v39 = vld [vmem:[%s881_s23 + $0x8] sm:$0xff] }
  0x99   : > { %v418_v12 = vpop.permute.xlu0 %417 }
  0x9a   : > { %682 = vmatmul.mubr.msk.f32.vlgmr.msra.gmra.mrb[0].mxu0 %vm298_vm0, %v278_v40  ;;  %v292_v53 = vpop.permute.xlu1 %291 }
  0x9b   : > { %381 = vmatprep.mubr.f32.mxu0 %v772_v5 }
  0x9e   : > { %683 = vmatmul.mubr.msk.f32.gmra.mrb[2].mxu0 %vm298_vm0, %v279_v41  ;;  %v296_v6 = vpop.permute.xlu1 %295 }
  0x9f   : > { %387 = vmatprep.mubr.f32.mxu0 %v772_v5 }
  0xa2   : > { %684 = vmatmul.mubr.msk.f32.gmra.mrb[4].mxu0 %vm298_vm0, %v280_v42  ;;  %v455_v42 = vld [vmem:[%s881_s23 + $0x10] sm:$0xff] }
  0xa3   : > { %393 = vmatprep.mubr.f32.mxu0 %v772_v5  ;;  %v422_v21 = vpop.permute.xlu1 %421 }
  0xa6   : > { %685 = vmatmul.mubr.msk.f32.gmra.mrb[6].mxu0 %vm298_vm0, %v281_v43 }
 0x16d   : > { %v377_v47 = vpop.f32.mrb[0].mxu0 }
 0x16e   : > { %v378_v48 = vadd.f32 %v377_v47, %v284_v46  ;;  %v379_v49 = vpop.f32.mrb[1].mxu0 }
 0x16f   : > { %v380_v50 = vadd.f32 %v379_v49, %v284_v46  ;;  %v479_v49 = vld [vmem:[%s838_s30 + $0x8] sm:$0xff] }
 0x170   : > { %v400_v51 = vmax.f32 %v378_v48, 0.0  ;;  %v478_v48 = vld [vmem:[%s838_s30] sm:$0xff] }
 0x171   : > { %v401_v52 = vmax.f32 %v380_v50, 0.0  ;;  %v383_v54 = vpop.f32.mrb[2].mxu0 }
 0x172   : > { %v424_v55 = vadd.f32 %v410_v45, %v400_v51  ;;  %v384_v56 = vadd.f32 %v383_v54, %v288_v44  ;;  %v385_v57 = vpop.f32.mrb[3].mxu0 }
 0x173   : > { %v425_v58 = vadd.f32 %v410_v45, %v401_v52  ;;  %v386_v60 = vadd.f32 %v385_v57, %v288_v44  ;;  %v456_v45 = vld [vmem:[%s881_s23 + $0x18] sm:$0xff] }
 0x174   : > { %v432_v61 = vmax.f32 %v424_v55, 0.0  ;;  %v402_v62 = vmax.f32 %v384_v56, 0.0  ;;  %v480_v56 = vld [vmem:[%s838_s30 + $0x10] sm:$0xff] }
 0x175   : > { %v433_v63 = vmax.f32 %v425_v58, 0.0  ;;  %v403_v0 = vmax.f32 %v386_v60, 0.0  ;;  %v389_v1 = vpop.f32.mrb[4].mxu0  ;;  %v481_v60 = vld [vmem:[%s838_s30 + $0x18] sm:$0xff] }
 0x176   : > { %v426_v2 = vadd.f32 %v414_v59, %v402_v62  ;;  %v390_v3 = vadd.f32 %v389_v1, %v292_v53  ;;  %v391_v4 = vpop.f32.mrb[5].mxu0 }
 0x177   : > { %v427_v5 = vadd.f32 %v414_v59, %v403_v0  ;;  %v392_v7 = vadd.f32 %v391_v4, %v292_v53  ;;  %546 = vmatprep.mubr.f32.mxu0 %v433_v63  ;;  %v457_v8 = vadd.f32 %v433_v63, %v432_v61 }
 0x178   : > { %v434_v9 = vmax.f32 %v426_v2, 0.0  ;;  %v404_v10 = vmax.f32 %v390_v3, 0.0 }
 0x179   : > { %v435_v11 = vmax.f32 %v427_v5, 0.0  ;;  %v405_v13 = vmax.f32 %v392_v7, 0.0  ;;  %v395_v14 = vpop.f32.mrb[6].mxu0  ;;  %458 = vadd.xlane.f32.xlu0 %v457_v8 }
 0x17a   : > { %v701_v15 = vpack.c.bf16 %v434_v9, %v432_v61  ;;  %v428_v16 = vadd.f32 %v418_v12, %v404_v10  ;;  %v396_v17 = vadd.f32 %v395_v14, %v296_v6  ;;  %v397_v18 = vpop.f32.mrb[7].mxu0 }
 0x17b   : > { %v429_v19 = vadd.f32 %v418_v12, %v405_v13  ;;  %v398_v20 = vadd.f32 %v397_v18, %v296_v6  ;;  %551 = vmatprep.mubr.f32.mxu1 %v435_v11  ;;  %v460_v22 = vadd.f32 %v435_v11, %v434_v9  ;;  %v699_v23 = vpack.c.bf16 %v435_v11, %v433_v63 }
 0x17c   : > { %v436_v24 = vmax.f32 %v428_v16, 0.0  ;;  %v406_v25 = vmax.f32 %v396_v17, 0.0 }
 0x17d   : > { %v437_v26 = vmax.f32 %v429_v19, 0.0  ;;  %v407_v27 = vmax.f32 %v398_v20, 0.0  ;;  %461 = vadd.xlane.f32.xlu1 %v460_v22  ;;  %700 = vmatprep.subr.bf16.mxu0 %v699_v23 }
 0x17e   : > { %v430_v28 = vadd.f32 %v422_v21, %v406_v25  ;;  %707 = vmatprep.subr.bf16.mxu1 %v699_v23  ;;  %702 = vmatpush1.bf16.xpose.msra.mxu0 %v701_v15 }
 0x17f   : > { %v431_v29 = vadd.f32 %v422_v21, %v407_v27  ;;  %709 = vmatpush1.bf16.xpose.msra.mxu1 %v701_v15  ;;  %v463_v30 = vadd.f32 %v437_v26, %v436_v24 }
 0x180   : > { %v438_v31 = vmax.f32 %v430_v28, 0.0 }
 0x181   : > { %v439_v32 = vmax.f32 %v431_v29, 0.0  ;;  %464 = vadd.xlane.f32.xlu0 %v463_v30 }
 0x182   : > { %v705_v33 = vpack.c.bf16 %v438_v31, %v436_v24 }
 0x183   : > { %v703_v34 = vpack.c.bf16 %v439_v32, %v437_v26  ;;  %v466_v35 = vadd.f32 %v439_v32, %v438_v31 }
 0x185   : > { %704 = vmatprep.subr.bf16.mxu0 %v703_v34  ;;  %708 = vmatprep.subr.bf16.mxu1 %v703_v34 }
 0x186   : > { %467 = vadd.xlane.f32.xlu0 %v466_v35  ;;  %706 = vmatpush1.bf16.xpose.msra.mxu0 %v705_v33 }
 0x187   : > { %710 = vmatpush1.bf16.xpose.msra.mxu1 %v705_v33 }
 0x18d   : > { %547 = vmatmul.mubr.f32.vlgmr.msra.gmra.mrb[8].mxu0 %v432_v61 }
 0x18e   : > { %552 = vmatmul.mubr.f32.vlgmr.msra.gmra.mrb[0].mxu1 %v434_v9 }
 0x18f   : > { %556 = vmatprep.mubr.f32.mxu1 %v437_v26 }
 0x192   : > { %557 = vmatmul.mubr.f32.gmra.mrb[2].mxu1 %v436_v24 }
 0x193   : > { %561 = vmatprep.mubr.f32.mxu1 %v439_v32 }
 0x196   : > { %562 = vmatmul.mubr.f32.gmra.mrb[4].mxu1 %v438_v31 }
 0x206   : > { %v459_v37 = vpop.xlane.xlu0 %458 }
 0x207   : > { %v469_v38 = vadd.f32 %v459_v37, %v453_v36 }
 0x209   : > { %474 = vst.msk [vmem:[%s881_s23] sm:$0xff] %vm444_vm1, %v469_v38 }
 0x20a   : > { %v462_v40 = vpop.xlane.xlu1 %461 }
 0x20b   : > { %v470_v41 = vadd.f32 %v462_v40, %v454_v39 }
 0x20d   : > { %475 = vst.msk [vmem:[%s881_s23 + $0x8] sm:$0xff] %vm444_vm1, %v470_v41 }
 0x20e   : > { %v465_v43 = vpop.xlane.xlu0 %464 }
 0x20f   : > { %v471_v44 = vadd.f32 %v465_v43, %v455_v42 }
 0x211   : > { %476 = vst.msk [vmem:[%s881_s23 + $0x10] sm:$0xff] %vm444_vm1, %v471_v44 }
 0x213   : > { %v468_v46 = vpop.xlane.xlu0 %467 }
 0x214   : > { %v472_v47 = vadd.f32 %v468_v46, %v456_v45 }
 0x216   : > { %477 = vst.msk [vmem:[%s881_s23 + $0x18] sm:$0xff] %vm444_vm1, %v472_v47 }
 0x260   : > { %v548_v50 = vpop.f32.mrb[8].mxu0 }
 0x261   : > { %v567_v51 = vadd.f32 %v548_v50, %v478_v48  ;;  %v553_v52 = vpop.f32.mrb[0].mxu1  ;;  %v550_v53 = vpop.f32.mrb[9].mxu0 }
 0x262   : > { %v568_v54 = vadd.f32 %v553_v52, %v479_v49  ;;  %v555_v55 = vpop.f32.mrb[1].mxu1 }
 0x263   : > { %571 = vst.msk [vmem:[%s838_s30] sm:$0xff] %vm298_vm0, %v567_v51 }
 0x264   : > { %572 = vst.msk [vmem:[%s838_s30 + $0x8] sm:$0xff] %vm298_vm0, %v568_v54 }
 0x265   : > { %v558_v57 = vpop.f32.mrb[2].mxu1 }
 0x266   : > { %v569_v58 = vadd.f32 %v558_v57, %v480_v56  ;;  %v560_v59 = vpop.f32.mrb[3].mxu1 }
 0x268   : > { %573 = vst.msk [vmem:[%s838_s30 + $0x10] sm:$0xff] %vm298_vm0, %v569_v58 }
 0x269   : > { %v563_v61 = vpop.f32.mrb[4].mxu1 }
 0x26a   : > { %v570_v62 = vadd.f32 %v563_v61, %v481_v60  ;;  %v565_v63 = vpop.f32.mrb[5].mxu1 }
 0x26c   : > { %574 = vst.msk [vmem:[%s838_s30 + $0x18] sm:$0xff] %vm298_vm0, %v570_v62 }
 0x26d PF: > { %s15_s17 = sadd.s32 1, %s769_s17   ;;  %s933_s15 = smov %s765_s16 }
 0x26e   : > { %p12_p5 = scmp.ge.s32.totalorder %s15_s17, 4   ;;  %s934_s16 = smov %s936_s18 }
 0x270   :  { %14 = sbr.rel (!%p12_p5) target bundleno = 2 (0x2), region = 78 }

// kernel: noise_no_pool_block.5
= control target key start
LH: loop header
LB: loop body
LE: loop exit
PB: predicated region body
PF: predicated region fallthrough
CT: control target
= control target key end

     0   :  { %s677_s12 = smov 0   ;;  %s823_s0 = inlined_call_operand.vmem [shape: f32[2,32,256], index: 0, kind: input, shape index: {}]   ;;  %s824_s1 = inlined_call_operand.vmem [shape: f32[32,128], index: 1, kind: input, shape index: {}]   ;;  %s825_s2 = inlined_call_operand.vmem [shape: f32[2,32,32], index: 2, kind: input, shape index: {}]   ;;  %s826_s3 = inlined_call_operand.vmem [shape: f32[2,32,256], index: 3, kind: output, shape index: {}]  }
   0x1 LB: > { %s582_s13 = sadd.s32 4294967295, %s650_s12   ;;  %p586_p0 = scmp.ge.s32.totalorder %s650_s12, 1  ;;  %s650_s12 = sphi %s677_s12, %s13_s12  }
   0x2   : > { %p137_p1 = scmp.lt.s32.totalorder %s650_s12, 3 }
   0x4   : > { %p138_p2 = pnand %p586_p0, %p137_p1 }
   0x5   : > { %v688_v0 = vld [vmem:[%s824_s1 + $0x10] sm:$0xff] (!%p138_p2)  ;;  %v693_v1 = vld [vmem:[%s824_s1] sm:$0xff] (!%p138_p2)  ;;  %v652_v2 = vmov (!%p138_p2), 0   ;;  %v700_v3 = vld [vmem:[%s824_s1 + $0x18] sm:$0xff] (!%p138_p2)  ;;  %v653_v5 = vmov (!%p138_p2), 0.0   ;;  %v654_v6 = vmov (!%p138_p2), 2  }
   0x6   : > { %141 = sbr.rel (%p138_p2) target bundleno = 624 (0x270), region = 32  ;;  %637 = vset.pattern.permute.xlu1 (!%p138_p2), %v652_v2  ;;  %636 = vset.pattern.permute.xlu0 (!%p138_p2), %v652_v2  ;;  %v705_v4 = vld [vmem:[%s824_s1 + $0x8] sm:$0xff] (!%p138_p2)  ;;  %v655_v7 = vmov (!%p138_p2), 1   ;;  %p161_p3 = scmp.lt.s32.totalorder (!%p138_p2), %s582_s13, 1  ;;  %v219_v40 = vld [vmem:[%s825_s2] sm:$0xff] (!%p138_p2)  ;;  %vm239_vm0 = vcmask (!%p138_p2), 261120  }
   0x7   : > { %195 = vperm.xlu1 (!%p138_p2), %637, %v688_v0   ;;  %185 = vperm.xlu0 (!%p138_p2), %636, %v693_v1   ;;  %v220_v41 = vld [vmem:[%s825_s2 + $0x8] sm:$0xff] (!%p138_p2)  ;;  %v221_v42 = vld [vmem:[%s825_s2 + $0x10] sm:$0xff] (!%p138_p2)  ;;  %v222_v43 = vld [vmem:[%s825_s2 + $0x18] sm:$0xff] (!%p138_p2)  ;;  %v656_v44 = vmov (!%p138_p2), 3  }
   0x8   : > { %316 = vmatprep.mubr.f32.mxu0 (!%p138_p2), %v653_v5  ;;  %478 = vmatprep.mubr.f32.mxu1 (!%p138_p2), %v653_v5 }
   0xb   : > { %200 = vperm.xlu1 (!%p138_p2), %637, %v700_v3   ;;  %190 = vperm.xlu0 (!%p138_p2), %636, %v705_v4  }
   0xd   : > { %s828_s13 = smov (!%p161_p3, %s582_s13), 1 }
   0xe   : > { %s605_s22 = sshll.u32 %s828_s13, 6 }
   0xf   : > { %639 = vset.pattern.permute.xlu1 %v654_v6  ;;  %638 = vset.pattern.permute.xlu0 %v654_v6  ;;  %s165_s25 = scalar_lea.vmem %s823_s0, %s605_s22  ;;  %s803_s19 = scalar_lea.vmem %s826_s3, %s605_s22 }
  0x10   : > { %228 = vperm.xlu1 %639, %v705_v4   ;;  %224 = vperm.xlu0 %638, %v693_v1   ;;  %v731_v8 = vld [vmem:[%s165_s25 + $0x28] sm:$0xff]  ;;  %v733_v9 = vld [vmem:[%s165_s25] sm:$0xff]  ;;  %v739_v15 = vld [vmem:[%s165_s25 + $0x38] sm:$0xff] }
  0x11   : > { %v735_v12 = vld [vmem:[%s165_s25 + $0x8] sm:$0xff]  ;;  %v741_v16 = vld [vmem:[%s165_s25 + $0x10] sm:$0xff]  ;;  %v743_v17 = vld [vmem:[%s165_s25 + $0x18] sm:$0xff] }
  0x12   : > { %v745_v18 = vld [vmem:[%s165_s25 + $0x20] sm:$0xff]  ;;  %v748_v20 = vld [vmem:[%s165_s25 + $0x30] sm:$0xff] }
  0x14   : > { %232 = vperm.xlu1 %639, %v688_v0   ;;  %236 = vperm.xlu0 %638, %v700_v3  }
  0x18   : > { %640 = vset.pattern.permute.xlu1 %v655_v7  ;;  %641 = vset.pattern.permute.xlu0 %v655_v7 }
  0x19   : > { %350 = vperm.xlu1 %640, %v693_v1   ;;  %354 = vperm.xlu0 %641, %v705_v4  }
  0x1d   : > { %358 = vperm.xlu1 %640, %v688_v0   ;;  %642 = vset.pattern.permute.xlu0 %v656_v44 }
  0x1e   : > { %387 = vperm.xlu0 %642, %v693_v1  }
  0x21   : > { %362 = vperm.xlu1 %640, %v700_v3  }
  0x22   : > { %399 = vperm.xlu0 %642, %v700_v3  }
  0x25   : > { %643 = vset.pattern.permute.xlu1 %v656_v44  ;;  %v597_v44 = vld [vmem:[%s825_s2 + $0x30] sm:$0xff] }
  0x26   : > { %391 = vperm.xlu1 %643, %v705_v4  }
  0x2a   : > { %395 = vperm.xlu1 %643, %v688_v0  }
  0x86   : > { %v196_v10 = vpop.permute.xlu1 %195  ;;  %v186_v11 = vpop.permute.xlu0 %185 }
  0x87   : > { %v208_v13 = vadd.f32 %v196_v10, %v731_v8  ;;  %v203_v14 = vadd.f32 %v186_v11, %v733_v9  ;;  %v204_v19 = vadd.f32 %v186_v11, %v735_v12  ;;  %v207_v26 = vadd.f32 %v196_v10, %v745_v18 }
  0x89   : > { %v216_v27 = vmax.f32 %v208_v13, 0.0  ;;  %v211_v28 = vmax.f32 %v203_v14, 0.0  ;;  %v212_v32 = vmax.f32 %v204_v19, 0.0  ;;  %v215_v36 = vmax.f32 %v207_v26, 0.0 }
  0x8a   : > { %v201_v21 = vpop.permute.xlu1 %200  ;;  %v191_v22 = vpop.permute.xlu0 %190 }
  0x8b   : > { %v210_v23 = vadd.f32 %v201_v21, %v739_v15  ;;  %v205_v24 = vadd.f32 %v191_v22, %v741_v16  ;;  %v206_v25 = vadd.f32 %v191_v22, %v743_v17  ;;  %v209_v29 = vadd.f32 %v201_v21, %v748_v20 }
  0x8d   : > { %v218_v30 = vmax.f32 %v210_v23, 0.0  ;;  %v213_v31 = vmax.f32 %v205_v24, 0.0  ;;  %v214_v33 = vmax.f32 %v206_v25, 0.0  ;;  %v217_v37 = vmax.f32 %v209_v29, 0.0 }
  0x8f   : > { %v607_v34 = vpack.c.bf16 %v214_v33, %v212_v32  ;;  %v609_v35 = vpack.c.bf16 %v213_v31, %v211_v28  ;;  %v611_v38 = vpack.c.bf16 %v218_v30, %v216_v27  ;;  %v613_v39 = vpack.c.bf16 %v217_v37, %v215_v36  ;;  %v229_v45 = vpop.permute.xlu1 %228  ;;  %v225_v46 = vpop.permute.xlu0 %224 }
  0x91   : > { %608 = vmatprep.subr.bf16.mxu0 %v607_v34 }
  0x92   : > { %610 = vmatpush1.bf16.msra.mxu0 %v609_v35 }
  0x93   : > { %612 = vmatprep.subr.bf16.mxu0 %v611_v38  ;;  %v233_v47 = vpop.permute.xlu1 %232  ;;  %v237_v49 = vpop.permute.xlu0 %236 }
  0x96   : > { %614 = vmatpush1.bf16.msra.mxu0 %v613_v39 }
  0x98   : > { %v351_v54 = vpop.permute.xlu1 %350  ;;  %v355_v60 = vpop.permute.xlu0 %354 }
  0x99   : > { %591 = vmatmul.mubr.msk.f32.vlgmr.msra.gmra.mrb[0].mxu0 %vm239_vm0, %v219_v40 }
  0x9a   : > { %322 = vmatprep.mubr.f32.mxu0 %v653_v5 }
  0x9c   : > { %v359_v6 = vpop.permute.xlu1 %358 }
  0x9d   : > { %592 = vmatmul.mubr.msk.f32.gmra.mrb[2].mxu0 %vm239_vm0, %v220_v41 }
  0x9e   : > { %328 = vmatprep.mubr.f32.mxu0 %v653_v5 }
  0xa0   : > { %v363_v31 = vpop.permute.xlu1 %362 }
  0xa1   : > { %593 = vmatmul.mubr.msk.f32.gmra.mrb[4].mxu0 %vm239_vm0, %v221_v42  ;;  %v595_v42 = vld [vmem:[%s825_s2 + $0x20] sm:$0xff] }
  0xa2   : > { %334 = vmatprep.mubr.f32.mxu0 %v653_v5 }
  0xa5   : > { %594 = vmatmul.mubr.msk.f32.gmra.mrb[6].mxu0 %vm239_vm0, %v222_v43  ;;  %v596_v43 = vld [vmem:[%s825_s2 + $0x28] sm:$0xff] }
 0x16c   : > { %v318_v48 = vpop.f32.mrb[0].mxu0 }
 0x16d   : > { %v319_v50 = vadd.f32 %v318_v48, %v225_v46  ;;  %v320_v51 = vpop.f32.mrb[1].mxu0  ;;  %v392_v48 = vpop.permute.xlu1 %391 }
 0x16e   : > { %v321_v52 = vadd.f32 %v320_v51, %v225_v46  ;;  %v388_v46 = vpop.permute.xlu0 %387 }
 0x16f   : > { %v341_v53 = vmax.f32 %v319_v50, 0.0 }
 0x170   : > { %v342_v55 = vmax.f32 %v321_v52, 0.0  ;;  %v324_v56 = vpop.f32.mrb[2].mxu0 }
 0x171   : > { %v325_v57 = vadd.f32 %v324_v56, %v229_v45  ;;  %v326_v58 = vpop.f32.mrb[3].mxu0  ;;  %v365_v61 = vadd.f32 %v351_v54, %v341_v53 }
 0x172   : > { %v327_v59 = vadd.f32 %v326_v58, %v229_v45  ;;  %v366_v1 = vadd.f32 %v351_v54, %v342_v55  ;;  %v598_v45 = vld [vmem:[%s825_s2 + $0x38] sm:$0xff] }
 0x173   : > { %v343_v62 = vmax.f32 %v325_v57, 0.0  ;;  %v373_v11 = vmax.f32 %v365_v61, 0.0 }
 0x174   : > { %v344_v63 = vmax.f32 %v327_v59, 0.0  ;;  %v330_v0 = vpop.f32.mrb[4].mxu0  ;;  %v374_v22 = vmax.f32 %v366_v1, 0.0  ;;  %v396_v59 = vpop.permute.xlu1 %395 }
 0x175   : > { %v367_v2 = vadd.f32 %v355_v60, %v343_v62  ;;  %v331_v3 = vadd.f32 %v330_v0, %v233_v47  ;;  %v332_v4 = vpop.f32.mrb[5].mxu0 }
 0x176   : > { %v368_v7 = vadd.f32 %v355_v60, %v344_v63  ;;  %v333_v10 = vadd.f32 %v332_v4, %v233_v47 }
 0x177   : > { %v375_v13 = vmax.f32 %v367_v2, 0.0  ;;  %v345_v14 = vmax.f32 %v331_v3, 0.0  ;;  %v400_v3 = vpop.permute.xlu0 %399 }
 0x178   : > { %v346_v19 = vmax.f32 %v333_v10, 0.0  ;;  %v336_v21 = vpop.f32.mrb[6].mxu0  ;;  %v376_v23 = vmax.f32 %v368_v7, 0.0 }
 0x179   : > { %v337_v24 = vadd.f32 %v336_v21, %v237_v49  ;;  %v338_v25 = vpop.f32.mrb[7].mxu0  ;;  %v617_v26 = vpack.c.bf16 %v375_v13, %v373_v11  ;;  %v369_v29 = vadd.f32 %v359_v6, %v345_v14 }
 0x17a   : > { %v339_v27 = vadd.f32 %v338_v25, %v237_v49  ;;  %v615_v28 = vpack.c.bf16 %v376_v23, %v374_v22  ;;  %v370_v32 = vadd.f32 %v359_v6, %v346_v19 }
 0x17b   : > { %v347_v30 = vmax.f32 %v337_v24, 0.0  ;;  %v377_v36 = vmax.f32 %v369_v29, 0.0 }
 0x17c   : > { %v348_v33 = vmax.f32 %v339_v27, 0.0  ;;  %616 = vmatprep.subr.bf16.mxu1 %v615_v28  ;;  %v378_v38 = vmax.f32 %v370_v32, 0.0 }
 0x17d   : > { %v371_v34 = vadd.f32 %v363_v31, %v347_v30  ;;  %618 = vmatpush1.bf16.msra.mxu1 %v617_v26 }
 0x17e   : > { %v372_v35 = vadd.f32 %v363_v31, %v348_v33 }
 0x17f   : > { %v379_v37 = vmax.f32 %v371_v34, 0.0 }
 0x180   : > { %v380_v39 = vmax.f32 %v372_v35, 0.0 }
 0x181   : > { %v621_v40 = vpack.c.bf16 %v379_v37, %v377_v36 }
 0x182   : > { %v619_v41 = vpack.c.bf16 %v380_v39, %v378_v38 }
 0x184   : > { %620 = vmatprep.subr.bf16.mxu1 %v619_v41 }
 0x185   : > { %622 = vmatpush1.bf16.msra.mxu1 %v621_v40 }
 0x188   : > { %599 = vmatmul.mubr.msk.f32.vlgmr.msra.gmra.mrb[0].mxu1 %vm239_vm0, %v595_v42 }
 0x189   : > { %484 = vmatprep.mubr.f32.mxu1 %v653_v5 }
 0x18c   : > { %600 = vmatmul.mubr.msk.f32.gmra.mrb[2].mxu1 %vm239_vm0, %v596_v43 }
 0x18d   : > { %490 = vmatprep.mubr.f32.mxu1 %v653_v5 }
 0x190   : > { %601 = vmatmul.mubr.msk.f32.gmra.mrb[4].mxu1 %vm239_vm0, %v597_v44 }
 0x191   : > { %496 = vmatprep.mubr.f32.mxu1 %v653_v5 }
 0x194   : > { %602 = vmatmul.mubr.msk.f32.gmra.mrb[6].mxu1 %vm239_vm0, %v598_v45 }
 0x25b   : > { %v480_v47 = vpop.f32.mrb[0].mxu1 }
 0x25c   : > { %v481_v49 = vadd.f32 %v480_v47, %v388_v46  ;;  %v482_v50 = vpop.f32.mrb[1].mxu1 }
 0x25d   : > { %v483_v51 = vadd.f32 %v482_v50, %v388_v46 }
 0x25e   : > { %v503_v52 = vadd.f32 %v481_v49, %v733_v9 }
 0x25f   : > { %v504_v5 = vadd.f32 %v483_v51, %v735_v12  ;;  %v486_v53 = vpop.f32.mrb[2].mxu1 }
 0x260   : > { %v511_v54 = vmax.f32 %v503_v52, 0.0  ;;  %v487_v55 = vadd.f32 %v486_v53, %v392_v48  ;;  %v488_v56 = vpop.f32.mrb[3].mxu1 }
 0x261   : > { %v512_v57 = vmax.f32 %v504_v5, 0.0  ;;  %v489_v58 = vadd.f32 %v488_v56, %v392_v48 }
 0x262   : > { %519 = vst [vmem:[%s803_s19] sm:$0xff] %v511_v54  ;;  %v505_v9 = vadd.f32 %v487_v55, %v741_v16 }
 0x263   : > { %520 = vst [vmem:[%s803_s19 + $0x8] sm:$0xff] %v512_v57  ;;  %v506_v60 = vadd.f32 %v489_v58, %v743_v17  ;;  %v492_v61 = vpop.f32.mrb[4].mxu1 }
 0x264   : > { %v513_v62 = vmax.f32 %v505_v9, 0.0  ;;  %v493_v63 = vadd.f32 %v492_v61, %v396_v59  ;;  %v494_v12 = vpop.f32.mrb[5].mxu1 }
 0x265   : > { %v514_v0 = vmax.f32 %v506_v60, 0.0  ;;  %v495_v1 = vadd.f32 %v494_v12, %v396_v59 }
 0x266   : > { %521 = vst [vmem:[%s803_s19 + $0x10] sm:$0xff] %v513_v62  ;;  %v507_v2 = vadd.f32 %v493_v63, %v745_v18 }
 0x267   : > { %522 = vst [vmem:[%s803_s19 + $0x18] sm:$0xff] %v514_v0  ;;  %v508_v16 = vadd.f32 %v495_v1, %v731_v8  ;;  %v498_v4 = vpop.f32.mrb[6].mxu1 }
 0x268   : > { %v515_v6 = vmax.f32 %v507_v2, 0.0  ;;  %v499_v17 = vadd.f32 %v498_v4, %v400_v3  ;;  %v500_v7 = vpop.f32.mrb[7].mxu1 }
 0x269   : > { %v516_v10 = vmax.f32 %v508_v16, 0.0  ;;  %v501_v11 = vadd.f32 %v500_v7, %v400_v3 }
 0x26a   : > { %523 = vst [vmem:[%s803_s19 + $0x20] sm:$0xff] %v515_v6  ;;  %v509_v13 = vadd.f32 %v499_v17, %v748_v20 }
 0x26b   : > { %524 = vst [vmem:[%s803_s19 + $0x28] sm:$0xff] %v516_v10  ;;  %v510_v14 = vadd.f32 %v501_v11, %v739_v15 }
 0x26c   : > { %v517_v19 = vmax.f32 %v509_v13, 0.0 }
 0x26d   : > { %v518_v18 = vmax.f32 %v510_v14, 0.0 }
 0x26e   : > { %525 = vst [vmem:[%s803_s19 + $0x30] sm:$0xff] %v517_v19 }
 0x26f   : > { %526 = vst [vmem:[%s803_s19 + $0x38] sm:$0xff] %v518_v18 }
 0x270 PF: > { %s13_s12 = sadd.s32 1, %s650_s12  }
 0x271   : > { %p10_p4 = scmp.ge.s32.totalorder %s13_s12, 4  }
 0x273   :  { %12 = sbr.rel (!%p10_p4) target bundleno = 1 (0x1), region = 63 }

</bundles_post_ra>
